<compile_context>
chip_gen: v6e
topology: v6e:2x2x1
jax: 0.10.0
libtpu: 0.0.40
codegen_flags: <defaults>
</compile_context>

<pallas_src>
import functools

import numpy as np
import jax
import jax.numpy as jnp
from jax.experimental import pallas as pl
from jax.experimental.pallas import tpu as pltpu

_LANE = 128


# ---------------------------------------------------------------------------
# Kernels
# ---------------------------------------------------------------------------
def _locscale_packed_kernel(x_ref, w_ref, b_ref, out_ref, *, out_dim):
    """Tight-packed heads: columns = [loc | scale | zero-pad], one output slab."""
    y = jnp.dot(x_ref[...], w_ref[...], preferred_element_type=jnp.float32)
    y = y + b_ref[...].astype(jnp.float32)
    # Column id >= out_dim -> scale head (softplus); columns < out_dim -> loc.
    col = jax.lax.broadcasted_iota(jnp.int32, y.shape, 1)
    softplus = jnp.maximum(y, 0.0) + jnp.log1p(jnp.exp(-jnp.abs(y)))
    out_ref[...] = jnp.where(col >= out_dim, softplus, y).astype(out_ref.dtype)


def _locscale_split_kernel(x_ref, w_ref, b_ref, loc_ref, scale_ref, *, split):
    """out_dim % 128 == 0: two separate lane-dense outputs, no column mask."""
    y = jnp.dot(x_ref[...], w_ref[...], preferred_element_type=jnp.float32)
    y = y + b_ref[...].astype(jnp.float32)
    loc = y[:, :split]
    s = y[:, split:]
    loc_ref[...] = loc.astype(loc_ref.dtype)
    scale_ref[...] = (jnp.maximum(s, 0.0)
                      + jnp.log1p(jnp.exp(-jnp.abs(s)))).astype(scale_ref.dtype)


# ---------------------------------------------------------------------------
# Parameter fusion (run ONCE at model init, not per forward)
# ---------------------------------------------------------------------------
def make_fused_params(w_loc, b_loc, w_scale, b_scale, *,
                      compute_dtype=jnp.bfloat16):
    """Pack both heads into one lane-dense weight panel + f32 bias row.

    w_*: (in_dim, out_dim)  (already transposed from PyTorch (out, in))
    b_*: (out_dim,)
    Returns (w_cat, b_cat): (in_dim, cols) compute_dtype, (1, cols) float32,
    with cols = 2*out_dim padded (total only) to the next multiple of 128.
    """
    in_dim, out_dim = w_loc.shape
    cols = max(_LANE, pl.cdiv(2 * out_dim, _LANE) * _LANE)
    w_cat = jnp.zeros((in_dim, cols), dtype=compute_dtype)
    w_cat = w_cat.at[:, :out_dim].set(w_loc.astype(compute_dtype))
    w_cat = w_cat.at[:, out_dim:2 * out_dim].set(w_scale.astype(compute_dtype))
    b_cat = jnp.zeros((1, cols), dtype=jnp.float32)
    b_cat = b_cat.at[0, :out_dim].set(b_loc.astype(jnp.float32))
    b_cat = b_cat.at[0, out_dim:2 * out_dim].set(b_scale.astype(jnp.float32))
    return w_cat, b_cat


# ---------------------------------------------------------------------------
# VMEM / tile budgeting
# ---------------------------------------------------------------------------
def _vmem_budget_bytes():
    """~75% of per-core VMEM (v5e/v6e: 128 MiB, v7x: 64 MiB), capped at 100 MiB."""
    cap = 64 << 20   # conservative fallback (v7x per-TC)
    try:
        info = pltpu.get_tpu_info()
        cap = int(getattr(info, "vmem_capacity_bytes", cap))
    except Exception:
        pass
    return min((cap * 3) // 4, 100 << 20)


def _pick_tm(B, per_row_bytes, tile_budget, *, block_rows):
    """Largest row tile fitting tile_budget, MXU/sublane aligned, capped so the
    grid has >= 2 programs (megacore) when the batch is big enough."""
    row_mult = 256 if B >= 512 else 16     # 256: MXU tile; 16: bf16 sublanes
    fit = max(tile_budget // max(per_row_bytes, 1), row_mult)
    tm = min(block_rows, fit, pl.cdiv(B, row_mult) * row_mult)
    if B >= 2 * row_mult:                  # keep both v7x TensorCores busy
        tm = min(tm, pl.cdiv(pl.cdiv(B, 2), row_mult) * row_mult)
    tm = max(row_mult, (tm // row_mult) * row_mult)
    return int(tm)


# ---------------------------------------------------------------------------
# Forward
# ---------------------------------------------------------------------------
def loc_scale_fused(x, w_cat, b_cat, out_dim, *, block_rows=1024):
    """LocScale forward from pre-fused params.  x: (B, in_dim).
    Returns loc (B, out_dim), scale (B, out_dim) in x.dtype, scale > 0."""
    B, in_dim = x.shape
    cols = w_cat.shape[1]
    out_dtype = x.dtype
    compute_dtype = w_cat.dtype
    w_bytes = np.dtype(compute_dtype).itemsize
    o_bytes = np.dtype(out_dtype).itemsize

    aligned = (out_dim % _LANE == 0) and (cols == 2 * out_dim)

    # --- VMEM budget -> batch tile -----------------------------------------
    # resident: fused weight (2 pipeline buffers, conservatively) + bias + slack
    resident = 2 * in_dim * cols * w_bytes + 4 * cols * 4 + (4 << 20)
    # per-row: double-buffered x tile + double-buffered output tile(s)
    per_row = 2 * in_dim * w_bytes + 2 * cols * o_bytes
    budget = _vmem_budget_bytes()
    tm = _pick_tm(B, per_row, budget - resident, block_rows=block_rows)
    footprint = resident + per_row * tm
    vmem_limit = int(max(footprint, 16 << 20))   # never clamp below footprint

    # --- batch padding / grid ------------------------------------------------
    B_pad = pl.cdiv(B, tm) * tm
    xc = x.astype(compute_dtype)
    if B_pad != B:
        xc = jnp.pad(xc, ((0, B_pad - B), (0, 0)))
    grid = (B_pad // tm,)

    in_specs = [
        pl.BlockSpec((tm, in_dim), lambda i: (i, 0)),      # x tile (pipelined)
        pl.BlockSpec((in_dim, cols), lambda i: (0, 0)),    # resident fused W
        pl.BlockSpec((1, cols), lambda i: (0, 0)),         # resident f32 bias
    ]
    cp = pltpu.CompilerParams(
        dimension_semantics=("parallel",),   # shard batch over v7x's 2 TCs
        vmem_limit_bytes=vmem_limit,
    )

    if aligned:
        loc, scale = pl.pallas_call(
            functools.partial(_locscale_split_kernel, split=out_dim),
            out_shape=(jax.ShapeDtypeStruct((B_pad, out_dim), out_dtype),
                       jax.ShapeDtypeStruct((B_pad, out_dim), out_dtype)),
            grid_spec=pltpu.PrefetchScalarGridSpec(
                num_scalar_prefetch=0, grid=grid,
                in_specs=in_specs,
                out_specs=[pl.BlockSpec((tm, out_dim), lambda i: (i, 0)),
                           pl.BlockSpec((tm, out_dim), lambda i: (i, 0))]),
            compiler_params=cp,
        )(xc, w_cat, b_cat)
        if B_pad != B:
            loc, scale = loc[:B], scale[:B]
        return loc, scale

    y = pl.pallas_call(
        functools.partial(_locscale_packed_kernel, out_dim=out_dim),
        out_shape=jax.ShapeDtypeStruct((B_pad, cols), out_dtype),
        grid_spec=pltpu.PrefetchScalarGridSpec(
            num_scalar_prefetch=0, grid=grid,
            in_specs=in_specs,
            out_specs=pl.BlockSpec((tm, cols), lambda i: (i, 0))),
        compiler_params=cp,
    )(xc, w_cat, b_cat)
    return y[:B, :out_dim], y[:B, out_dim:2 * out_dim]


def loc_scale(x, w_loc, b_loc, w_scale, b_scale, *,
              compute_dtype=jnp.bfloat16, block_rows=1024):
    """Convenience wrapper (re-fuses params each call; prefer
    make_fused_params() once + loc_scale_fused() in a real model)."""
    out_dim = w_loc.shape[1]
    w_cat, b_cat = make_fused_params(w_loc, b_loc, w_scale, b_scale,
                                     compute_dtype=compute_dtype)
    return loc_scale_fused(x, w_cat, b_cat, out_dim, block_rows=block_rows)


def _reference(x, w_loc, b_loc, w_scale, b_scale):
    loc = x @ w_loc + b_loc
    s = x @ w_scale + b_scale
    return loc, jax.nn.softplus(s)


if __name__ == "__main__":
    key = jax.random.PRNGKey(0)

    def make_inputs(k, B, in_dim, out_dim):
        kx, kwl, kbl, kws, kbs = jax.random.split(k, 5)
        bound = 1.0 / (in_dim ** 0.5)
        x = jax.random.normal(kx, (B, in_dim), dtype=jnp.float32)
        w_loc = jax.random.uniform(kwl, (in_dim, out_dim), jnp.float32, -bound, bound)
        b_loc = jax.random.uniform(kbl, (out_dim,), jnp.float32, -bound, bound)
        w_scale = jax.random.uniform(kws, (in_dim, out_dim), jnp.float32, -bound, bound)
        b_scale = jax.random.uniform(kbs, (out_dim,), jnp.float32, -bound, bound)
        return x, w_loc, b_loc, w_scale, b_scale

    k1, k2, k3 = jax.random.split(key, 3)

    # 1) Small spec-sized shape, exact f32 compute path (hoisted fused params).
    x, wl, bl, ws, bs = make_inputs(k1, B=8, in_dim=32, out_dim=16)
    w_cat, b_cat = make_fused_params(wl, bl, ws, bs, compute_dtype=jnp.float32)
    loc, scale = loc_scale_fused(x, w_cat, b_cat, out_dim=16)
    jax.block_until_ready((loc, scale))
    ref_loc, ref_scale = _reference(x, wl, bl, ws, bs)
    assert loc.shape == (8, 16) and scale.shape == (8, 16)
    assert jnp.allclose(loc, ref_loc, atol=1e-5, rtol=1e-5)
    assert jnp.allclose(scale, ref_scale, atol=1e-5, rtol=1e-5)
    assert bool(jnp.all(scale > 0.0))

    # 2) Same shape, default bf16 compute path (f32 accumulate + f32 epilogue).
    loc_bf, scale_bf = loc_scale(x, wl, bl, ws, bs)
    jax.block_until_ready((loc_bf, scale_bf))
    assert jnp.allclose(loc_bf, ref_loc, atol=5e-2, rtol=5e-2)
    assert jnp.allclose(scale_bf, ref_scale, atol=5e-2, rtol=5e-2)
    assert bool(jnp.all(scale_bf > 0.0))

    # 3) Multi-tile batch: exercises row padding and the >=2-program grid.
    x3, wl3, bl3, ws3, bs3 = make_inputs(k2, B=600, in_dim=64, out_dim=16)
    loc3, scale3 = loc_scale(x3, wl3, bl3, ws3, bs3)
    jax.block_until_ready((loc3, scale3))
    r_loc3, r_scale3 = _reference(x3, wl3, bl3, ws3, bs3)
    assert loc3.shape == (600, 16) and scale3.shape == (600, 16)
    assert jnp.allclose(loc3, r_loc3, atol=5e-2, rtol=5e-2)
    assert jnp.allclose(scale3, r_scale3, atol=5e-2, rtol=5e-2)

    # 4) 128-aligned head -> two-output path (no post-call column slices).
    x4, wl4, bl4, ws4, bs4 = make_inputs(k3, B=8, in_dim=32, out_dim=128)
    w4, b4 = make_fused_params(wl4, bl4, ws4, bs4, compute_dtype=jnp.float32)
    loc4, scale4 = loc_scale_fused(x4, w4, b4, out_dim=128)
    jax.block_until_ready((loc4, scale4))
    r_loc4, r_scale4 = _reference(x4, wl4, bl4, ws4, bs4)
    assert jnp.allclose(loc4, r_loc4, atol=1e-5, rtol=1e-5)
    assert jnp.allclose(scale4, r_scale4, atol=1e-5, rtol=1e-5)

    print("KERNEL_OK")
</pallas_src>

<mosaic_0001>
module attributes {stable_mosaic.version = 11 : i64} {
  func.func @_locscale_packed_kernel(%arg0: i32, %arg1: memref<16x32xf32, #tpu.memory_space<vmem>>, %arg2: memref<32x128xf32, #tpu.memory_space<vmem>>, %arg3: memref<1x128xf32, #tpu.memory_space<vmem>>, %arg4: memref<16x128xf32, #tpu.memory_space<vmem>>) attributes {dimension_semantics = [#tpu.dimension_semantics<parallel>], iteration_bounds = array<i64: 1>, scalar_prefetch = 0 : i64, scratch_operands = 0 : i64, tpu.core_type = #tpu.core_type<tc>, window_params = [{transform_indices = @transform_0, window_bounds = array<i64: 16, 32>}, {pipeline_mode = #tpu.pipeline_mode<synchronous>, transform_indices = @transform_1, window_bounds = array<i64: 32, 128>}, {pipeline_mode = #tpu.pipeline_mode<synchronous>, transform_indices = @transform_2, window_bounds = array<i64: 1, 128>}, {transform_indices = @transform_3, window_bounds = array<i64: 16, 128>}]} {
    %c0 = arith.constant 0 : index
    %c0_0 = arith.constant 0 : index
    %0 = vector.load %arg1[%c0, %c0_0] : memref<16x32xf32, #tpu.memory_space<vmem>>, vector<16x32xf32>
    %c0_1 = arith.constant 0 : index
    %c0_2 = arith.constant 0 : index
    %1 = vector.load %arg2[%c0_1, %c0_2] : memref<32x128xf32, #tpu.memory_space<vmem>>, vector<32x128xf32>
    %cst = arith.constant dense<0.000000e+00> : vector<16x128xf32>
    %2 = tpu.matmul %0, %1, %cst {dimension_numbers = #tpu.dot_dimension_numbers<[1], [0], [0], [1], [0, 0, 1, 1], [], []>} : vector<16x32xf32>, vector<32x128xf32>, vector<16x128xf32> -> vector<16x128xf32>
    %c0_3 = arith.constant 0 : index
    %c0_4 = arith.constant 0 : index
    %3 = vector.load %arg3[%c0_3, %c0_4] : memref<1x128xf32, #tpu.memory_space<vmem>>, vector<1x128xf32>
    %4 = vector.broadcast %3 : vector<1x128xf32> to vector<16x128xf32>
    %5 = arith.addf %2, %4 : vector<16x128xf32>
    %6 = tpu.iota {dimensions = array<i32: 1>} : vector<16x128xi32>
    %cst_5 = arith.constant 0.000000e+00 : f32
    %7 = vector.broadcast %cst_5 : f32 to vector<16x128xf32>
    %8 = arith.maximumf %5, %7 : vector<16x128xf32>
    %9 = math.absf %5 : vector<16x128xf32>
    %cst_6 = arith.constant 0.000000e+00 : f32
    %10 = vector.broadcast %cst_6 : f32 to vector<16x128xf32>
    %11 = arith.subf %10, %9 : vector<16x128xf32>
    %12 = math.exp %11 : vector<16x128xf32>
    %13 = math.log1p %12 : vector<16x128xf32>
    %14 = arith.addf %8, %13 : vector<16x128xf32>
    %c16_i32 = arith.constant 16 : i32
    %15 = vector.broadcast %c16_i32 : i32 to vector<16x128xi32>
    %16 = arith.cmpi sge, %6, %15 : vector<16x128xi32>
    %17 = arith.select %16, %14, %5 : vector<16x128xi1>, vector<16x128xf32>
    %c0_7 = arith.constant 0 : index
    %c0_8 = arith.constant 0 : index
    %18 = vector.load %arg4[%c0_7, %c0_8] : memref<16x128xf32, #tpu.memory_space<vmem>>, vector<16x128xf32>
    tpu.vector_store %arg4[%c0_7, %c0_8], %17 {strides = array<i32>} : memref<16x128xf32, #tpu.memory_space<vmem>>, vector<16x128xf32>,
    return
  }
  func.func @transform_0(%arg0: i32) -> (i32, i32) {
    %c0_i32 = arith.constant 0 : i32
    %c0_i32_0 = arith.constant 0 : i32
    return %arg0, %c0_i32 : i32, i32
  }
  func.func @transform_1(%arg0: i32) -> (i32, i32) {
    %c0_i32 = arith.constant 0 : i32
    %c0_i32_0 = arith.constant 0 : i32
    %c0_i32_1 = arith.constant 0 : i32
    return %c0_i32, %c0_i32_0 : i32, i32
  }
  func.func @transform_2(%arg0: i32) -> (i32, i32) {
    %c0_i32 = arith.constant 0 : i32
    %c0_i32_0 = arith.constant 0 : i32
    %c0_i32_1 = arith.constant 0 : i32
    return %c0_i32, %c0_i32_0 : i32, i32
  }
  func.func @transform_3(%arg0: i32) -> (i32, i32) {
    %c0_i32 = arith.constant 0 : i32
    %c0_i32_0 = arith.constant 0 : i32
    return %arg0, %c0_i32 : i32, i32
  }
}

</mosaic_0001>

<bundles_post_ra>
// kernel: tpu_custom_call.1
= control target key start
LH: loop header
LB: loop body
LE: loop exit
PB: predicated region body
PF: predicated region fallthrough
CT: control target
= control target key end

     0   :  { %8 = vsyncpa [#allocation3], 0  ;;  %s340_s0 = inlined_call_operand.hbm [shape: f32[16,32], index: 0, kind: input, shape index: {}]   ;;  %s341_s1 = inlined_call_operand.hbm [shape: f32[32,128], index: 1, kind: input, shape index: {}]   ;;  %s342_s2 = inlined_call_operand.vmem [shape: f32[1,128], index: 2, kind: input, shape index: {}]   ;;  %s343_s3 = inlined_call_operand.hbm [shape: f32[16,128], index: 3, kind: output, shape index: {}]  }
   0x1   :  { %9 = vsyncpa [#allocation6], 0 }
   0x2   :  { %10 = vsyncpa [#allocation4], 0  ;;  %s292_s12 = smov [#allocation2]  }
   0x3   :  { %s16_s13 = sshll.u32 %s292_s12, 4  ;;  %s17_s13 = int_to_ptr.vmem [resolvable:$true] %s16_s13 }
   0x4   :  { %s234_s14 = scalar_lea.vmem %s17_s13, 256  ;;  %p239_p1 = scmp.lt.s32.totalorder %s17_s13, %s17_s13 }
   0x5   :  { %p235_p0 = scmp.ne.s32.totalorder %s17_s13, %s234_s14  ;;  %p240_p2 = scmp.lt.s32.totalorder %s234_s14, %s234_s14 }
   0x7   :  { %p241_p3 = por %p240_p2, %p239_p1 }
   0x9   :  { %p242_p4 = pnand %p241_p3, %p235_p0 }
   0xb   :  { %245 = shalt.err (!%p242_p4)
}
   0xc   :  { %s293_s15 = smov 128   ;;  %s294_s16 = smov 8  }
   0xd   :  { %22 = dma.hbm_to_vmem [thread:$0]  %s340_s0, 256, %s17_s13, [#allocation3], %s293_s15, %s293_s15, %s294_s16  }
   0xe   :  { %s295_s19 = smov [#allocation5]  }
   0xf   :  { %s28_s20 = sshll.u32 %s295_s19, 4  ;;  %s29_s20 = int_to_ptr.vmem [resolvable:$true] %s28_s20 }
  0x10   :  { %s254_s21 = scalar_lea.vmem %s29_s20, 512  ;;  %p259_p6 = scmp.lt.s32.totalorder %s29_s20, %s29_s20 }
  0x11   :  { %p255_p5 = scmp.ne.s32.totalorder %s29_s20, %s254_s21  ;;  %p260_p7 = scmp.lt.s32.totalorder %s254_s21, %s254_s21 }
  0x13   :  { %p261_p8 = por %p260_p7, %p259_p6 }
  0x15   :  { %p262_p9 = pnand %p261_p8, %p255_p5 }
  0x17   :  { %265 = shalt.err (!%p262_p9)
}
  0x18   :  { %34 = dma.hbm_to_vmem [thread:$0]  %s341_s1, 512, %s29_s20, [#allocation6], %s293_s15, %s293_s15, %s294_s16  }
  0x19   :  { %286 = dma.done.wait [#allocation3], 256  }
  0x1a   :  { %287 = vsyncadd [#allocation3], 4294967040 }
  0x1b   :  { %288 = dma.done.wait [#allocation6], 512  }
  0x1c   :  { %289 = vsyncadd [#allocation6], 4294966784  ;;  %vm56_vm0 = vcmask 261120   ;;  %v48_v0 = vld [vmem:[#allocation5 + $0x18] sm:$0xff]  ;;  %v47_v1 = vld [vmem:[#allocation5 + $0x10] sm:$0xff]  ;;  %v138_v23 = vlaneseq }
  0x1d   :  { %202 = vmatprep.subr.mxu0 %v48_v0  ;;  %v43_v2 = vld [vmem:[#allocation2] sm:$0xff]  ;;  %v46_v3 = vld [vmem:[#allocation5 + $0x8] sm:$0xff]  ;;  %v45_v4 = vld [vmem:[#allocation5] sm:$0xff] }
  0x1e   :  { %203 = vmatpush3.msra.mxu0 %v48_v0  ;;  %210 = vmatprep.mubr.msk.f32.mxu0 %vm56_vm0, %v43_v2  ;;  %v44_v5 = vld [vmem:[#allocation2 + $0x8] sm:$0xff]  ;;  %v193_v6 = vld [vmem:[%s342_s2] ss:$0 sm:$0xff]  ;;  %v139_v27 = vand.u32 127, %v138_v23  ;;  %s296_s2 = smov [#allocation7]  }
  0x1f   :  { %204 = vmatprep.subr.mxu0 %v47_v1  ;;  %s180_s24 = sshll.u32 %s296_s2, 4  ;;  %s181_s24 = int_to_ptr.vmem [resolvable:$true] %s180_s24 }
  0x20   :  { %205 = vmatpush3.msra.mxu0 %v47_v1  ;;  %vm170_vm2 = vcmp.ge.s32.totalorder %v139_v27, 16  ;;  %s266_s25 = scalar_lea.vmem %s181_s24, 256  ;;  %p271_p11 = scmp.lt.s32.totalorder %s181_s24, %s181_s24 }
  0x21   :  { %206 = vmatprep.subr.mxu0 %v46_v3  ;;  %p267_p10 = scmp.ne.s32.totalorder %s181_s24, %s266_s25  ;;  %p272_p12 = scmp.lt.s32.totalorder %s266_s25, %s266_s25 }
  0x22   :  { %207 = vmatpush3.msra.mxu0 %v46_v3 }
  0x23   :  { %208 = vmatprep.subr.mxu0 %v45_v4  ;;  %p273_p13 = por %p272_p12, %p271_p11 }
  0x24   :  { %209 = vmatpush3.msra.mxu0 %v45_v4 }
  0x25   :  { %211 = vmatmul.mubr.msk.f32.vlgmr.msra.gmra.mxu0 %vm56_vm0, %v44_v5  ;;  %p274_p0 = pnand %p273_p13, %p267_p10 }
  0xe5   :  { %v212_v7 = vpop.f32.mrf.mxu0 }
  0xe6   :  { %v135_v8 = vadd.f32 %v212_v7, %v193_v6 }
  0xe7   :  { %v129_v9 = vpop.f32.mrf.mxu0 }
  0xe8   :  { %v143_v10 = vand.u32 2147483647, %v135_v8  ;;  %v130_v11 = vadd.f32 %v193_v6, %v129_v9  ;;  %v141_v33 = vmax.f32 %v135_v8, 0.0 }
  0xea   :  { %v145_v12 = vsub.f32 0.0, %v143_v10  ;;  %v142_v13 = vand.u32 2147483647, %v130_v11  ;;  %v140_v38 = vmax.f32 %v130_v11, 0.0 }
  0xec   :  { %v148_v14 = vmul.f32 1.442695, %v145_v12  ;;  %v144_v15 = vsub.f32 0.0, %v142_v13 }
  0xee   :  { %218 = vpow2.f32 %v148_v14  ;;  %v146_v16 = vmul.f32 1.442695, %v144_v15 }
  0xf0   :  { %220 = vpow2.f32 %v146_v16 }
  0xfb   :  { %v219_v17 = vpop.eup %218 }
  0xfc   :  { %v159_v18 = vadd.f32 1.0, %v219_v17  ;;  %v162_v21 = vmul.f32 -0.5, %v219_v17  ;;  %v165_v25 = vand.u32 2147483647, %v219_v17 }
  0xfd   :  { %v221_v19 = vpop.eup %220 }
  0xfe   :  { %222 = vlog2.f32 %v159_v18  ;;  %v150_v20 = vadd.f32 1.0, %v221_v19  ;;  %v153_v22 = vmul.f32 -0.5, %v221_v19  ;;  %v163_v24 = vadd.f32 1.0, %v162_v21 }
  0xff   :  { %v156_v29 = vand.u32 2147483647, %v221_v19  ;;  %vm166_vm1 = vcmp.lt.f32.partialorder %v165_v25, 0.0004427343 }
 0x100   :  { %224 = vlog2.f32 %v150_v20  ;;  %v154_v26 = vadd.f32 1.0, %v153_v22  ;;  %v164_v31 = vmul.f32 %v219_v17, %v163_v24 }
 0x101   :  { %vm157_vm3 = vcmp.lt.f32.partialorder %v156_v29, 0.0004427343 }
 0x102   :  { %v155_v36 = vmul.f32 %v221_v19, %v154_v26 }
 0x10b   :  { %v223_v28 = vpop.eup %222 }
 0x10c   :  { %v161_v30 = vmul.f32 0.6931472, %v223_v28 }
 0x10d   :  { %v225_v32 = vpop.eup %224 }
 0x10e   :  { %v167_v34 = vsel %vm166_vm1, %v164_v31, %v161_v30  ;;  %v152_v35 = vmul.f32 0.6931472, %v225_v32 }
 0x10f   :  { %v169_v37 = vadd.f32 %v167_v34, %v141_v33 }
 0x110   :  { %v158_v39 = vsel %vm157_vm3, %v155_v36, %v152_v35 }
 0x111   :  { %v168_v40 = vadd.f32 %v158_v39, %v140_v38  ;;  %v172_v41 = vsel %vm170_vm2, %v169_v37, %v135_v8 }
 0x112   :  { %174 = vst [vmem:[#allocation7 + $0x8] sm:$0xff] %v172_v41 }
 0x113   :  { %v171_v42 = vsel %vm170_vm2, %v168_v40, %v130_v11 }
 0x114   :  { %173 = vst [vmem:[#allocation7] sm:$0xff] %v171_v42 }
 0x115   :  { %277 = shalt.err (!%p274_p0)
}
 0x116   :  { %186 = dma.vmem_to_hbm [thread:$0]  %s181_s24, 256, %s343_s3, [#allocation4], %s293_s15, %s293_s15, %s294_s16  }
 0x117   :  { %290 = dma.done.wait [#allocation4], 256  }
 0x118   :  { %291 = vsyncadd [#allocation4], 4294967040 }
 0x119   :  { %190 = vsyncpa [#allocation3], 1 }
 0x11a   :  { %191 = vsyncpa [#allocation6], 1 }
 0x11b   :  { %192 = vsyncpa [#allocation4], 1 }

</bundles_post_ra>
